<compile_context>
chip_gen: v5e
topology: v5e:2x2
jax: 0.10.0
libtpu: 0.0.40
codegen_flags: <defaults>
</compile_context>

<pallas_src>
import jax
import jax.numpy as jnp
from jax import lax
from jax.experimental import pallas as pl
from jax.experimental.pallas import tpu as pltpu

IMAGE_SIZE = 28
IN_DIM = IMAGE_SIZE * IMAGE_SIZE   # 784
HID_DIM = 128
OUT_DIM = 1


def _round_up(n, m):
    return ((n + m - 1) // m) * m


def energy_kernel(x_ref, w1_ref, b1_ref, w2_ref, b2_ref, o_ref):
    # Layer 1: (TB, 784) @ (784, 128) on the MXU, f32 accumulate; bias + ReLU on VPU.
    h = jnp.dot(x_ref[...], w1_ref[...], preferred_element_type=jnp.float32)
    h = jnp.maximum(h + b1_ref[...], 0.0)                       # (TB, 128) f32
    # Layer 2: contract hidden dim of (1,128) W2 against (TB,128) h -> lane-dense (1, TB).
    e = lax.dot_general(
        w2_ref[...], h,
        dimension_numbers=(((1,), (1,)), ((), ())),
        preferred_element_type=jnp.float32)                     # (1, TB)
    o_ref[...] = (e + b2_ref[0, 0]).astype(o_ref.dtype)         # scalar b2 from SMEM


def _choose_tile(batch, max_tb):
    """Batch tile size. Tiny batches: one sublane-rounded tile. Large batches: biggest
    128-aligned tile that still leaves >= 4 grid steps (2 per TensorCore on v7x)."""
    if batch <= 128:
        return _round_up(max(batch, 8), 8)
    tb = _round_up(pl.cdiv(batch, 4), 128)        # aim for >= 4 grid steps
    tb = min(tb, _round_up(max_tb, 128))          # VMEM cap
    return max(tb, 128)


def _vmem_limit_bytes(tb, x_itemsize, w_itemsize):
    lane_in = _round_up(IN_DIM, 128)              # 784 lanes lay out as 896 in VMEM
    x_bufs = 2 * tb * lane_in * x_itemsize        # double-buffered activation tiles
    w1_bufs = 2 * IN_DIM * HID_DIM * w_itemsize   # resident weights (default 2 buffers)
    h_buf = tb * HID_DIM * 4                      # f32 hidden intermediate
    o_bufs = 2 * _round_up(tb, 128) * 4           # (1, TB) output blocks
    misc = 2 * 1024 * 1024                        # biases, spills, compiler scratch slack
    return min(x_bufs + w1_bufs + h_buf + o_bufs + misc, 64 * 1024 * 1024)


def energy_forward(x_nchw, w1, b1, w2, b2, *, max_tb=2048):
    """x_nchw: (B, 1, 28, 28) -> energy (B, 1) float32 (matches the torch module).

    w1: (784, 128)  (torch weight transposed, so kernel does x @ w1)
    b1: (1, 128)
    w2: (1, 128)    (torch layout: (out, in))
    b2: (1, 1)

    If x arrives as bfloat16 (cast by the upstream producer), the kernel streams it as-is
    (half the HBM traffic) and only W1 is cast to match; accumulation stays float32.
    """
    B = x_nchw.shape[0]
    x_flat = x_nchw.reshape(B, -1)                  # == torch x.view(B, -1), (B, 784)

    if x_flat.dtype == jnp.bfloat16:
        w1 = w1.astype(jnp.bfloat16)                # tiny (392 KiB), negligible cast

    tb = _choose_tile(B, max_tb)
    n_tiles = pl.cdiv(B, tb)
    b_out = n_tiles * tb                            # output is allocated tile-aligned

    if B < tb:
        # Tiny single-tile path: pad a handful of rows (cheap) so the block is in-bounds.
        x_flat = jnp.pad(x_flat, ((0, tb - B), (0, 0)))
    # Large-batch path: no jnp.pad — the ragged trailing block reads unspecified rows,
    # which only reach output lanes >= B; those are sliced off below.

    x_isz = jnp.dtype(x_flat.dtype).itemsize
    w_isz = jnp.dtype(w1.dtype).itemsize
    cost = pl.CostEstimate(
        flops=2 * B * IN_DIM * HID_DIM + 2 * B * HID_DIM * OUT_DIM,
        transcendentals=0,
        bytes_accessed=(B * IN_DIM * x_isz + b_out * 4
                        + IN_DIM * HID_DIM * w_isz + (2 * HID_DIM + 1) * 4),
    )

    out_row = pl.pallas_call(
        energy_kernel,
        out_shape=jax.ShapeDtypeStruct((1, b_out), jnp.float32),
        grid_spec=pltpu.PrefetchScalarGridSpec(
            num_scalar_prefetch=0,
            grid=(n_tiles,),
            in_specs=[
                pl.BlockSpec((tb, IN_DIM), lambda i: (i, 0)),          # x tile (pipelined)
                pl.BlockSpec((IN_DIM, HID_DIM), lambda i: (0, 0)),     # W1 (VMEM-resident)
                pl.BlockSpec((1, HID_DIM), lambda i: (0, 0)),          # b1
                pl.BlockSpec((1, HID_DIM), lambda i: (0, 0)),          # W2 (torch (out,in))
                pl.BlockSpec(memory_space=pltpu.MemorySpace.SMEM),     # b2 scalar
            ],
            out_specs=pl.BlockSpec((1, tb), lambda i: (0, i)),         # lane-dense energies
        ),
        compiler_params=pltpu.CompilerParams(
            dimension_semantics=("parallel",),                         # megacore-shardable
            vmem_limit_bytes=_vmem_limit_bytes(tb, x_isz, w_isz)),
        cost_estimate=cost,
    )(x_flat, w1, b1, w2, b2)

    return out_row[0, :B].reshape(B, 1)


def init_params(key):
    """Deterministic init mimicking PyTorch nn.Linear default (uniform +-1/sqrt(fan_in))."""
    k1, k2, k3, k4 = jax.random.split(key, 4)
    bound1 = 1.0 / jnp.sqrt(jnp.float32(IN_DIM))
    bound2 = 1.0 / jnp.sqrt(jnp.float32(HID_DIM))
    w1 = jax.random.uniform(k1, (IN_DIM, HID_DIM), jnp.float32, -bound1, bound1)
    b1 = jax.random.uniform(k2, (1, HID_DIM), jnp.float32, -bound1, bound1)
    w2 = jax.random.uniform(k3, (OUT_DIM, HID_DIM), jnp.float32, -bound2, bound2)
    b2 = jax.random.uniform(k4, (1, OUT_DIM), jnp.float32, -bound2, bound2)
    return w1, b1, w2, b2


if __name__ == "__main__":
    key = jax.random.PRNGKey(0)
    kx, kx2, kp = jax.random.split(key, 3)
    w1, b1, w2, b2 = init_params(kp)

    def ref_energy(x):
        xf = x.reshape(x.shape[0], -1).astype(jnp.float32)
        return jnp.maximum(xf @ w1 + b1, 0.0) @ w2.T + b2

    # 1) Tiny batch: single sublane-rounded tile (grid=(1,)).
    B = 4
    x = jax.random.normal(kx, (B, 1, IMAGE_SIZE, IMAGE_SIZE), jnp.float32)
    e = jax.block_until_ready(energy_forward(x, w1, b1, w2, b2))
    assert e.shape == (B, 1)
    assert jnp.allclose(e, ref_energy(x), atol=1e-4, rtol=1e-4)

    # 2) Ragged multi-tile path (no jnp.pad): B=200 -> tb=128, grid=(2,), last block partial.
    #    Verifies that unspecified OOB rows never leak into the valid output lanes.
    B2 = 200
    x2 = jax.random.normal(kx2, (B2, 1, IMAGE_SIZE, IMAGE_SIZE), jnp.float32)
    e2 = jax.block_until_ready(energy_forward(x2, w1, b1, w2, b2))
    assert e2.shape == (B2, 1)
    assert jnp.allclose(e2, ref_energy(x2), atol=1e-4, rtol=1e-4)
    assert jnp.all(jnp.isfinite(e2))

    # 3) bf16 activations supplied by the caller (simulates an upstream bf16 producer):
    #    kernel streams bf16 x directly, only W1 is cast; f32 accumulate.
    x_bf16 = x2.astype(jnp.bfloat16)
    e_bf16 = jax.block_until_ready(energy_forward(x_bf16, w1, b1, w2, b2))
    assert e_bf16.shape == (B2, 1)
    assert jnp.allclose(e_bf16, ref_energy(x2), atol=5e-2, rtol=5e-2)

    print("KERNEL_OK")
</pallas_src>

<mosaic_0001>
module attributes {stable_mosaic.version = 11 : i64} {
  func.func @energy_kernel(%arg0: i32, %arg1: memref<8x784xf32, #tpu.memory_space<vmem>>, %arg2: memref<784x128xf32, #tpu.memory_space<vmem>>, %arg3: memref<1x128xf32, #tpu.memory_space<vmem>>, %arg4: memref<1x128xf32, #tpu.memory_space<vmem>>, %arg5: memref<1x1xf32, #tpu.memory_space<smem>>, %arg6: memref<1x8xf32, #tpu.memory_space<vmem>>) attributes {dimension_semantics = [#tpu.dimension_semantics<parallel>], iteration_bounds = array<i64: 1>, scalar_prefetch = 0 : i64, scratch_operands = 0 : i64, tpu.core_type = #tpu.core_type<tc>, window_params = [{transform_indices = @transform_0, window_bounds = array<i64: 8, 784>}, {pipeline_mode = #tpu.pipeline_mode<synchronous>, transform_indices = @transform_1, window_bounds = array<i64: 784, 128>}, {pipeline_mode = #tpu.pipeline_mode<synchronous>, transform_indices = @transform_2, window_bounds = array<i64: 1, 128>}, {pipeline_mode = #tpu.pipeline_mode<synchronous>, transform_indices = @transform_3, window_bounds = array<i64: 1, 128>}, {transform_indices = @transform_4, window_bounds = array<i64: 1, 1>}, {transform_indices = @transform_5, window_bounds = array<i64: 1, 8>}]} {
    %c0 = arith.constant 0 : index
    %c0_0 = arith.constant 0 : index
    %0 = vector.load %arg1[%c0, %c0_0] : memref<8x784xf32, #tpu.memory_space<vmem>>, vector<8x784xf32>
    %c0_1 = arith.constant 0 : index
    %c0_2 = arith.constant 0 : index
    %1 = vector.load %arg2[%c0_1, %c0_2] : memref<784x128xf32, #tpu.memory_space<vmem>>, vector<784x128xf32>
    %cst = arith.constant dense<0.000000e+00> : vector<8x128xf32>
    %2 = tpu.matmul %0, %1, %cst {dimension_numbers = #tpu.dot_dimension_numbers<[1], [0], [0], [1], [0, 0, 1, 1], [], []>} : vector<8x784xf32>, vector<784x128xf32>, vector<8x128xf32> -> vector<8x128xf32>
    %c0_3 = arith.constant 0 : index
    %c0_4 = arith.constant 0 : index
    %3 = vector.load %arg3[%c0_3, %c0_4] : memref<1x128xf32, #tpu.memory_space<vmem>>, vector<1x128xf32>
    %4 = vector.broadcast %3 : vector<1x128xf32> to vector<8x128xf32>
    %5 = arith.addf %2, %4 : vector<8x128xf32>
    %cst_5 = arith.constant 0.000000e+00 : f32
    %6 = vector.broadcast %cst_5 : f32 to vector<8x128xf32>
    %7 = arith.maximumf %5, %6 : vector<8x128xf32>
    %c0_6 = arith.constant 0 : index
    %c0_7 = arith.constant 0 : index
    %8 = vector.load %arg4[%c0_6, %c0_7] : memref<1x128xf32, #tpu.memory_space<vmem>>, vector<1x128xf32>
    %cst_8 = arith.constant dense<0.000000e+00> : vector<1x8xf32>
    %9 = tpu.matmul %8, %7, %cst_8 {dimension_numbers = #tpu.dot_dimension_numbers<[1], [1], [0], [0], [0, 0, 1, 0], [], []>} : vector<1x128xf32>, vector<8x128xf32>, vector<1x8xf32> -> vector<1x8xf32>
    %c0_9 = arith.constant 0 : index
    %c0_10 = arith.constant 0 : index
    %10 = memref.load %arg5[%c0_9, %c0_10] : memref<1x1xf32, #tpu.memory_space<smem>>
    %11 = vector.broadcast %10 : f32 to vector<1x8xf32>
    %12 = arith.addf %9, %11 : vector<1x8xf32>
    %c0_11 = arith.constant 0 : index
    %c0_12 = arith.constant 0 : index
    %13 = vector.load %arg6[%c0_11, %c0_12] : memref<1x8xf32, #tpu.memory_space<vmem>>, vector<1x8xf32>
    tpu.vector_store %arg6[%c0_11, %c0_12], %12 {strides = array<i32>} : memref<1x8xf32, #tpu.memory_space<vmem>>, vector<1x8xf32>,
    return
  }
  func.func @transform_0(%arg0: i32) -> (i32, i32) {
    %c0_i32 = arith.constant 0 : i32
    %c0_i32_0 = arith.constant 0 : i32
    return %arg0, %c0_i32 : i32, i32
  }
  func.func @transform_1(%arg0: i32) -> (i32, i32) {
    %c0_i32 = arith.constant 0 : i32
    %c0_i32_0 = arith.constant 0 : i32
    %c0_i32_1 = arith.constant 0 : i32
    return %c0_i32, %c0_i32_0 : i32, i32
  }
  func.func @transform_2(%arg0: i32) -> (i32, i32) {
    %c0_i32 = arith.constant 0 : i32
    %c0_i32_0 = arith.constant 0 : i32
    %c0_i32_1 = arith.constant 0 : i32
    return %c0_i32, %c0_i32_0 : i32, i32
  }
  func.func @transform_3(%arg0: i32) -> (i32, i32) {
    %c0_i32 = arith.constant 0 : i32
    %c0_i32_0 = arith.constant 0 : i32
    %c0_i32_1 = arith.constant 0 : i32
    return %c0_i32, %c0_i32_0 : i32, i32
  }
  func.func @transform_4(%arg0: i32) -> (i32, i32) {
    %c0_i32 = arith.constant 0 : i32
    %c0_i32_0 = arith.constant 0 : i32
    %c0_i32_1 = arith.constant 0 : i32
    return %c0_i32, %c0_i32_0 : i32, i32
  }
  func.func @transform_5(%arg0: i32) -> (i32, i32) {
    %c0_i32 = arith.constant 0 : i32
    %c0_i32_0 = arith.constant 0 : i32
    return %c0_i32, %arg0 : i32, i32
  }
}

</mosaic_0001>

<bundles_post_ra>
// kernel: tpu_custom_call.1
= control target key start
LH: loop header
LB: loop body
LE: loop exit
PB: predicated region body
PF: predicated region fallthrough
CT: control target
= control target key end

     0   :  { %11 = vsyncpa [#allocation4], 0  ;;  %s487_s0 = inlined_call_operand.hbm [shape: f32[8,784], index: 0, kind: input, shape index: {}]   ;;  %s488_s1 = inlined_call_operand.hbm [shape: f32[784,128], index: 1, kind: input, shape index: {}]   ;;  %s489_s2 = inlined_call_operand.vmem [shape: f32[1,128], index: 2, kind: input, shape index: {}]   ;;  %s490_s3 = inlined_call_operand.vmem [shape: f32[1,128], index: 3, kind: input, shape index: {}]   ;;  %s491_s4 = inlined_call_operand.<no memory space> [shape: f32[1,1], index: 4, kind: input, shape index: {}]   ;;  %s492_s5 = inlined_call_operand.hbm [shape: f32[1,8], index: 5, kind: output, shape index: {}]  }
   0x1   :  { %12 = vsyncpa [#allocation7], 0 }
   0x2   :  { %13 = vsyncpa [#allocation5], 0  ;;  %s19_s20 = sshll.u32 %s487_s0, 4  ;;  %s434_s21 = smov [#allocation3]   ;;  %s20_s20 = int_to_ptr.hbm [resolvable:$true] %s19_s20 }
   0x3   :  { %s21_s22 = sshll.u32 %s434_s21, 4  ;;  %s29_s25 = sshll.u32 %s488_s1, 4  ;;  %s22_s22 = int_to_ptr.vmem [resolvable:$true] %s21_s22  ;;  %s30_s25 = int_to_ptr.hbm [resolvable:$true] %s29_s25 }
   0x4   :  { %24 = dma.hbm_to_vmem [thread:$0]  %s20_s20, 896, %s22_s22, [#allocation4]  }
   0x5   :  { %s435_s26 = smov [#allocation6]   ;;  %s436_s28 = smov 128  }
   0x6   :  { %s31_s27 = sshll.u32 %s435_s26, 4  ;;  %s437_s29 = smov 8   ;;  %s32_s27 = int_to_ptr.vmem [resolvable:$true] %s31_s27 }
   0x7   :  { %37 = dma.hbm_to_vmem [thread:$0]  %s30_s25, 12544, %s32_s27, [#allocation7], %s436_s28, %s436_s28, %s437_s29  }
   0x8   :  { %428 = dma.done.wait [#allocation4], 896  }
   0x9   :  { %429 = vsyncadd [#allocation4], 4294966400 }
   0xa   :  { %430 = dma.done.wait [#allocation7], 12544  }
   0xb   :  { %431 = vsyncadd [#allocation7], 4294954752  ;;  %v74_v0 = vld [vmem:[#allocation6 + $0x78] sm:$0xff]  ;;  %v73_v1 = vld [vmem:[#allocation6 + $0x70] sm:$0xff]  ;;  %vm161_vm0 = vcmask 130048   ;;  %s438_s8 = smov [#allocation8]  }
   0xc   :  { %v90_v2 = vld [vmem:[#allocation6 + $0xf8] sm:$0xff]  ;;  %165 = vmatpush.msra.mxu0 %v74_v0  ;;  %v89_v3 = vld [vmem:[#allocation6 + $0xf0] sm:$0xff]  ;;  %v72_v4 = vld [vmem:[#allocation6 + $0x68] sm:$0xff]  ;;  %s336_s9 = sshll.u32 %s438_s8, 4  ;;  %s338_s12 = sshll.u32 %s492_s5, 4  ;;  %vm329_vm1 = vcmask 57344   ;;  %s337_s9 = int_to_ptr.vmem [resolvable:$true] %s336_s9  ;;  %s339_s12 = int_to_ptr.hbm [resolvable:$true] %s338_s12 }
   0xd   :  { %185 = vmatpush.msra.mxu1 %v90_v2  ;;  %v88_v5 = vld [vmem:[#allocation6 + $0xe8] sm:$0xff]  ;;  %v71_v6 = vld [vmem:[#allocation6 + $0x60] sm:$0xff]  ;;  %v70_v8 = vld [vmem:[#allocation6 + $0x58] sm:$0xff] }
   0xe   :  { %166 = vmatpush.msra.mxu0 %v73_v1  ;;  %v87_v7 = vld [vmem:[#allocation6 + $0xe0] sm:$0xff]  ;;  %v86_v9 = vld [vmem:[#allocation6 + $0xd8] sm:$0xff]  ;;  %v69_v10 = vld [vmem:[#allocation6 + $0x50] sm:$0xff] }
   0xf   :  { %186 = vmatpush.msra.mxu1 %v89_v3  ;;  %v106_v11 = vld [vmem:[#allocation6 + $0x178] sm:$0xff]  ;;  %v85_v12 = vld [vmem:[#allocation6 + $0xd0] sm:$0xff]  ;;  %v104_v15 = vld [vmem:[#allocation6 + $0x168] sm:$0xff] }
  0x10   :  { %167 = vmatpush.msra.mxu0 %v72_v4  ;;  %205 = vmatpush.msra.mxu2 %v106_v11  ;;  %v105_v13 = vld [vmem:[#allocation6 + $0x170] sm:$0xff]  ;;  %v122_v14 = vld [vmem:[#allocation6 + $0x1f8] sm:$0xff]  ;;  %v68_v17 = vld [vmem:[#allocation6 + $0x48] sm:$0xff] }
  0x11   :  { %187 = vmatpush.msra.mxu1 %v88_v5  ;;  %v121_v16 = vld [vmem:[#allocation6 + $0x1f0] sm:$0xff]  ;;  %v84_v18 = vld [vmem:[#allocation6 + $0xc8] sm:$0xff]  ;;  %225 = vmatpush.msra.mxu3 %v122_v14  ;;  %v103_v19 = vld [vmem:[#allocation6 + $0x160] sm:$0xff] }
  0x12   :  { %168 = vmatpush.msra.mxu0 %v71_v6  ;;  %206 = vmatpush.msra.mxu2 %v105_v13  ;;  %v120_v20 = vld [vmem:[#allocation6 + $0x1e8] sm:$0xff]  ;;  %v67_v21 = vld [vmem:[#allocation6 + $0x40] sm:$0xff]  ;;  %v102_v23 = vld [vmem:[#allocation6 + $0x158] sm:$0xff] }
  0x13   :  { %188 = vmatpush.msra.mxu1 %v87_v7  ;;  %v83_v22 = vld [vmem:[#allocation6 + $0xc0] sm:$0xff]  ;;  %226 = vmatpush.msra.mxu3 %v121_v16  ;;  %v66_v25 = vld [vmem:[#allocation6 + $0x38] sm:$0xff]  ;;  %v101_v27 = vld [vmem:[#allocation6 + $0x150] sm:$0xff] }
  0x14   :  { %169 = vmatpush.msra.mxu0 %v70_v8  ;;  %207 = vmatpush.msra.mxu2 %v104_v15  ;;  %v119_v24 = vld [vmem:[#allocation6 + $0x1e0] sm:$0xff]  ;;  %v82_v26 = vld [vmem:[#allocation6 + $0xb8] sm:$0xff]  ;;  %v65_v29 = vld [vmem:[#allocation6 + $0x30] sm:$0xff] }
  0x15   :  { %189 = vmatpush.msra.mxu1 %v86_v9  ;;  %227 = vmatpush.msra.mxu3 %v120_v20  ;;  %v118_v28 = vld [vmem:[#allocation6 + $0x1d8] sm:$0xff]  ;;  %v81_v30 = vld [vmem:[#allocation6 + $0xb0] sm:$0xff]  ;;  %v100_v31 = vld [vmem:[#allocation6 + $0x148] sm:$0xff] }
  0x16   :  { %170 = vmatpush.msra.mxu0 %v69_v10  ;;  %208 = vmatpush.msra.mxu2 %v103_v19  ;;  %v117_v32 = vld [vmem:[#allocation6 + $0x1d0] sm:$0xff]  ;;  %v64_v33 = vld [vmem:[#allocation6 + $0x28] sm:$0xff]  ;;  %v99_v35 = vld [vmem:[#allocation6 + $0x140] sm:$0xff] }
  0x17   :  { %190 = vmatpush.msra.mxu1 %v85_v12  ;;  %228 = vmatpush.msra.mxu3 %v119_v24  ;;  %v80_v34 = vld [vmem:[#allocation6 + $0xa8] sm:$0xff]  ;;  %v63_v37 = vld [vmem:[#allocation6 + $0x20] sm:$0xff]  ;;  %v98_v39 = vld [vmem:[#allocation6 + $0x138] sm:$0xff] }
  0x18   :  { %171 = vmatpush.msra.mxu0 %v68_v17  ;;  %209 = vmatpush.msra.mxu2 %v102_v23  ;;  %v116_v36 = vld [vmem:[#allocation6 + $0x1c8] sm:$0xff]  ;;  %v79_v38 = vld [vmem:[#allocation6 + $0xa0] sm:$0xff]  ;;  %v62_v41 = vld [vmem:[#allocation6 + $0x18] sm:$0xff] }
  0x19   :  { %191 = vmatpush.msra.mxu1 %v84_v18  ;;  %229 = vmatpush.msra.mxu3 %v118_v28  ;;  %v115_v40 = vld [vmem:[#allocation6 + $0x1c0] sm:$0xff]  ;;  %v78_v42 = vld [vmem:[#allocation6 + $0x98] sm:$0xff]  ;;  %v97_v43 = vld [vmem:[#allocation6 + $0x130] sm:$0xff] }
  0x1a   :  { %172 = vmatpush.msra.mxu0 %v67_v21  ;;  %210 = vmatpush.msra.mxu2 %v101_v27  ;;  %v114_v44 = vld [vmem:[#allocation6 + $0x1b8] sm:$0xff]  ;;  %v61_v45 = vld [vmem:[#allocation6 + $0x10] sm:$0xff]  ;;  %v96_v47 = vld [vmem:[#allocation6 + $0x128] sm:$0xff] }
  0x1b   :  { %192 = vmatpush.msra.mxu1 %v83_v22  ;;  %230 = vmatpush.msra.mxu3 %v117_v32  ;;  %v77_v46 = vld [vmem:[#allocation6 + $0x90] sm:$0xff]  ;;  %v60_v49 = vld [vmem:[#allocation6 + $0x8] sm:$0xff]  ;;  %v95_v51 = vld [vmem:[#allocation6 + $0x120] sm:$0xff] }
  0x1c   :  { %173 = vmatpush.msra.mxu0 %v66_v25  ;;  %211 = vmatpush.msra.mxu2 %v100_v31  ;;  %v113_v48 = vld [vmem:[#allocation6 + $0x1b0] sm:$0xff]  ;;  %v76_v50 = vld [vmem:[#allocation6 + $0x88] sm:$0xff]  ;;  %v59_v53 = vld [vmem:[#allocation6] sm:$0xff] }
  0x1d   :  { %193 = vmatpush.msra.mxu1 %v82_v26  ;;  %231 = vmatpush.msra.mxu3 %v116_v36  ;;  %v112_v52 = vld [vmem:[#allocation6 + $0x1a8] sm:$0xff]  ;;  %v75_v54 = vld [vmem:[#allocation6 + $0x80] sm:$0xff]  ;;  %v138_v55 = vld [vmem:[#allocation6 + $0x278] sm:$0xff] }
  0x1e   :  { %174 = vmatpush.msra.mxu0 %v65_v29  ;;  %212 = vmatpush.msra.mxu2 %v99_v35  ;;  %v154_v56 = vld [vmem:[#allocation6 + $0x2f8] sm:$0xff]  ;;  %v111_v58 = vld [vmem:[#allocation6 + $0x1a0] sm:$0xff]  ;;  %v137_v59 = vld [vmem:[#allocation6 + $0x270] sm:$0xff] }
  0x1f   :  { %194 = vmatpush.msra.mxu1 %v81_v30  ;;  %232 = vmatpush.msra.mxu3 %v115_v40  ;;  %v94_v57 = vld [vmem:[#allocation6 + $0x118] sm:$0xff]  ;;  %v153_v60 = vld [vmem:[#allocation6 + $0x2f0] sm:$0xff]  ;;  %v136_v63 = vld [vmem:[#allocation6 + $0x268] sm:$0xff] }
  0x20   :  { %175 = vmatpush.msra.mxu0 %v64_v33  ;;  %213 = vmatpush.msra.mxu2 %v98_v39  ;;  %v93_v61 = vld [vmem:[#allocation6 + $0x110] sm:$0xff]  ;;  %v110_v62 = vld [vmem:[#allocation6 + $0x198] sm:$0xff]  ;;  %v152_v0 = vld [vmem:[#allocation6 + $0x2e8] sm:$0xff] }
  0x21   :  { %195 = vmatpush.msra.mxu1 %v80_v34  ;;  %233 = vmatpush.msra.mxu3 %v114_v44  ;;  %v92_v1 = vld [vmem:[#allocation6 + $0x108] sm:$0xff]  ;;  %v109_v2 = vld [vmem:[#allocation6 + $0x190] sm:$0xff]  ;;  %v135_v3 = vld [vmem:[#allocation6 + $0x260] sm:$0xff] }
  0x22   :  { %176 = vmatpush.msra.mxu0 %v63_v37  ;;  %214 = vmatpush.msra.mxu2 %v97_v43  ;;  %v151_v4 = vld [vmem:[#allocation6 + $0x2e0] sm:$0xff]  ;;  %v108_v6 = vld [vmem:[#allocation6 + $0x188] sm:$0xff]  ;;  %v134_v7 = vld [vmem:[#allocation6 + $0x258] sm:$0xff] }
  0x23   :  { %196 = vmatpush.msra.mxu1 %v79_v38  ;;  %234 = vmatpush.msra.mxu3 %v113_v48  ;;  %v91_v5 = vld [vmem:[#allocation6 + $0x100] sm:$0xff]  ;;  %v150_v8 = vld [vmem:[#allocation6 + $0x2d8] sm:$0xff]  ;;  %v133_v11 = vld [vmem:[#allocation6 + $0x250] sm:$0xff] }
  0x24   :  { %177 = vmatpush.msra.mxu0 %v62_v41  ;;  %215 = vmatpush.msra.mxu2 %v96_v47  ;;  %v54_v9 = vld [vmem:[#allocation3 + $0x10] sm:$0xff]  ;;  %v107_v10 = vld [vmem:[#allocation6 + $0x180] sm:$0xff]  ;;  %v149_v12 = vld [vmem:[#allocation6 + $0x2d0] sm:$0xff] }
  0x25   :  { %197 = vmatpush.msra.mxu1 %v78_v42  ;;  %235 = vmatpush.msra.mxu3 %v112_v52  ;;  %v52_v13 = vld [vmem:[#allocation3] sm:$0xff]  ;;  %v55_v14 = vld [vmem:[#allocation3 + $0x18] sm:$0xff]  ;;  %v53_v17 = vld [vmem:[#allocation3 + $0x8] sm:$0xff] }
  0x26   :  { %178 = vmatpush.msra.mxu0 %v61_v45  ;;  %216 = vmatpush.msra.mxu2 %v95_v51  ;;  %v132_v15 = vld [vmem:[#allocation6 + $0x248] sm:$0xff]  ;;  %v131_v19 = vld [vmem:[#allocation6 + $0x240] sm:$0xff]  ;;  %v130_v22 = vld [vmem:[#allocation6 + $0x238] sm:$0xff] }
  0x27   :  { %198 = vmatpush.msra.mxu1 %v77_v46  ;;  %236 = vmatpush.msra.mxu3 %v111_v58  ;;  %v148_v16 = vld [vmem:[#allocation6 + $0x2c8] sm:$0xff]  ;;  %v147_v20 = vld [vmem:[#allocation6 + $0x2c0] sm:$0xff]  ;;  %v146_v23 = vld [vmem:[#allocation6 + $0x2b8] sm:$0xff]  ;;  %v308_v58 = vstv %s491_s4 }
  0x28   :  { %179 = vmatpush.msra.mxu0 %v60_v49  ;;  %217 = vmatpush.msra.mxu2 %v94_v57  ;;  %v156_v18 = vld [vmem:[#allocation6 + $0x308] sm:$0xff]  ;;  %v155_v21 = vld [vmem:[#allocation6 + $0x300] sm:$0xff]  ;;  %v58_v24 = vld [vmem:[#allocation3 + $0x30] sm:$0xff] }
  0x29   :  { %199 = vmatpush.msra.mxu1 %v76_v50  ;;  %237 = vmatpush.msra.mxu3 %v110_v62  ;;  %v129_v25 = vld [vmem:[#allocation6 + $0x230] sm:$0xff]  ;;  %v128_v27 = vld [vmem:[#allocation6 + $0x228] sm:$0xff]  ;;  %v127_v29 = vld [vmem:[#allocation6 + $0x220] sm:$0xff] }
  0x2a   :  { %180 = vmatpush.msra.mxu0 %v59_v53  ;;  %218 = vmatpush.msra.mxu2 %v93_v61  ;;  %v145_v26 = vld [vmem:[#allocation6 + $0x2b0] sm:$0xff]  ;;  %v144_v28 = vld [vmem:[#allocation6 + $0x2a8] sm:$0xff]  ;;  %v143_v30 = vld [vmem:[#allocation6 + $0x2a0] sm:$0xff] }
  0x2b   :  { %200 = vmatpush.msra.mxu1 %v75_v54  ;;  %238 = vmatpush.msra.mxu3 %v109_v2  ;;  %v126_v31 = vld [vmem:[#allocation6 + $0x218] sm:$0xff]  ;;  %v125_v33 = vld [vmem:[#allocation6 + $0x210] sm:$0xff]  ;;  %v124_v35 = vld [vmem:[#allocation6 + $0x208] sm:$0xff] }
  0x2c   :  { %245 = vmatpush.msrb.mxu0 %v138_v55  ;;  %219 = vmatpush.msra.mxu2 %v92_v1  ;;  %v142_v32 = vld [vmem:[#allocation6 + $0x298] sm:$0xff]  ;;  %v141_v34 = vld [vmem:[#allocation6 + $0x290] sm:$0xff]  ;;  %v140_v36 = vld [vmem:[#allocation6 + $0x288] sm:$0xff] }
  0x2d   :  { %265 = vmatpush.msrb.mxu1 %v154_v56  ;;  %239 = vmatpush.msra.mxu3 %v108_v6  ;;  %v123_v37 = vld [vmem:[#allocation6 + $0x200] sm:$0xff]  ;;  %v56_v39 = vld [vmem:[#allocation3 + $0x20] sm:$0xff]  ;;  %v57_v40 = vld [vmem:[#allocation3 + $0x28] sm:$0xff] }
  0x2e   :  { %246 = vmatpush.msrb.mxu0 %v137_v59  ;;  %220 = vmatpush.msra.mxu2 %v91_v5  ;;  %v139_v38 = vld [vmem:[#allocation6 + $0x280] sm:$0xff]  ;;  %v355_v41 = vld [vmem:[%s489_s2] ss:$0 sm:$0xff] }
  0x2f   :  { %266 = vmatpush.msrb.mxu1 %v153_v60  ;;  %221 = vmatmul.f32.vlgmr.msra.gmra.mxu2 %v54_v9  ;;  %v306_v57 = vld [vmem:[%s490_s3] sm:$0x1] }
  0x30   :  { %247 = vmatpush.msrb.mxu0 %v136_v63  ;;  %240 = vmatpush.msra.mxu3 %v107_v10 }
  0x31   :  { %267 = vmatpush.msrb.mxu1 %v152_v0  ;;  %181 = vmatmul.f32.vlgmr.msra.gmra.mxu0 %v52_v13 }
  0x32   :  { %248 = vmatpush.msrb.mxu0 %v135_v3  ;;  %241 = vmatmul.f32.vlgmr.msra.gmra.mxu3 %v55_v14 }
  0x33   :  { %268 = vmatpush.msrb.mxu1 %v151_v4  ;;  %299 = vmatpush.msrb.mxu2 %v156_v18 }
  0x34   :  { %249 = vmatpush.msrb.mxu0 %v134_v7  ;;  %201 = vmatmul.f32.vlgmr.msra.gmra.mxu1 %v53_v17 }
  0x35   :  { %269 = vmatpush.msrb.mxu1 %v150_v8  ;;  %300 = vmatpush.msrb.mxu2 %v155_v21 }
  0x36   :  { %250 = vmatpush.msrb.mxu0 %v133_v11 }
  0x37   :  { %270 = vmatpush.msrb.mxu1 %v149_v12  ;;  %349 = vmatmul.msk.f32.vlgmr.msrb.gmra.mxu2 %vm161_vm0, %v58_v24 }
  0x38   :  { %251 = vmatpush.msrb.mxu0 %v132_v15 }
  0x39   :  { %271 = vmatpush.msrb.mxu1 %v148_v16 }
  0x3a   :  { %252 = vmatpush.msrb.mxu0 %v131_v19 }
  0x3b   :  { %272 = vmatpush.msrb.mxu1 %v147_v20 }
  0x3c   :  { %253 = vmatpush.msrb.mxu0 %v130_v22 }
  0x3d   :  { %273 = vmatpush.msrb.mxu1 %v146_v23 }
  0x3e   :  { %254 = vmatpush.msrb.mxu0 %v129_v25 }
  0x3f   :  { %274 = vmatpush.msrb.mxu1 %v145_v26 }
  0x40   :  { %255 = vmatpush.msrb.mxu0 %v128_v27 }
  0x41   :  { %275 = vmatpush.msrb.mxu1 %v144_v28 }
  0x42   :  { %256 = vmatpush.msrb.mxu0 %v127_v29 }
  0x43   :  { %276 = vmatpush.msrb.mxu1 %v143_v30 }
  0x44   :  { %257 = vmatpush.msrb.mxu0 %v126_v31 }
  0x45   :  { %277 = vmatpush.msrb.mxu1 %v142_v32 }
  0x46   :  { %258 = vmatpush.msrb.mxu0 %v125_v33 }
  0x47   :  { %278 = vmatpush.msrb.mxu1 %v141_v34 }
  0x48   :  { %259 = vmatpush.msrb.mxu0 %v124_v35 }
  0x49   :  { %279 = vmatpush.msrb.mxu1 %v140_v36 }
  0x4a   :  { %260 = vmatpush.msrb.mxu0 %v123_v37 }
  0x4b   :  { %280 = vmatpush.msrb.mxu1 %v139_v38  ;;  %261 = vmatmul.f32.vlgmr.msrb.gmra.mxu0 %v56_v39 }
  0x4c   :  { %281 = vmatmul.f32.vlgmr.msrb.gmra.mxu1 %v57_v40 }
  0xae   :  { %v182_v42 = vpop.f32.mrf.mxu0 }
  0xaf   :  { %v183_v43 = vadd.f32 %v355_v41, %v182_v42 }
  0xb1   :  { %v202_v44 = vpop.f32.mrf.mxu1 }
  0xb2   :  { %v203_v45 = vadd.f32 %v202_v44, %v183_v43  ;;  %v222_v46 = vpop.f32.mrf.mxu2 }
  0xb4   :  { %v223_v47 = vadd.f32 %v222_v46, %v203_v45 }
  0xb5   :  { %v242_v48 = vpop.f32.mrf.mxu3 }
  0xb6   :  { %v243_v49 = vadd.f32 %v242_v48, %v223_v47 }
  0xba   :  { %v302_v53 = vpop.f32.mrf.mxu2 }
  0xc8   :  { %v262_v50 = vpop.f32.mrf.mxu0 }
  0xc9   :  { %v282_v51 = vpop.f32.mrf.mxu1  ;;  %v263_v52 = vadd.f32 %v262_v50, %v243_v49 }
  0xcb   :  { %v283_v54 = vadd.f32 %v282_v51, %v263_v52 }
  0xcd   :  { %v303_v55 = vadd.f32 %v302_v53, %v283_v54 }
  0xcf   :  { %v305_v56 = vmax.f32 %v303_v55, 0.0 }
  0xd1   :  { %324 = vmatpush.xpose.msrb.mxu3 %v305_v56 }
  0xd4   :  { %325 = vmatmul.f32.vlgmr.msrb.gmra.mxu3 %v306_v57 }
 0x157   :  { %v326_v59 = vpop.f32.mrf.mxu3 }
 0x158   :  { %v327_v60 = vadd.f32 %v326_v59, %v308_v58 }
 0x15a   :  { %330 = vst.msk [vmem:[#allocation8] sm:$0x1] %vm329_vm1, %v327_v60 }
 0x15b   :  { %341 = dma.vmem_to_hbm [thread:$0]  %s337_s9, 16, %s339_s12, [#allocation5]  }
 0x15c   :  { %432 = dma.done.wait [#allocation5], 16  }
 0x15d   :  { %433 = vsyncadd [#allocation5], 4294967280 }
 0x15e   :  { %346 = vsyncpa [#allocation4], 1 }
 0x15f   :  { %347 = vsyncpa [#allocation7], 1 }
 0x160   :  { %348 = vsyncpa [#allocation5], 1 }

</bundles_post_ra>
